<compile_context>
chip_gen: v7x
topology: tpu7x:2x2x1
jax: 0.10.0
libtpu: 0.0.40
codegen_flags: <defaults>
</compile_context>

<pallas_src>
import functools

import jax
import jax.numpy as jnp
from jax.experimental import pallas as pl
from jax.experimental.pallas import tpu as pltpu

EPSILON = 5.0
_SELECT_GATHER_MAX_C = 128  # below this, gather means with VPU selects (skip MXU)


def _nc_loss_kernel(feat_ref, means_ref, labels_ref, out_ref, *,
                    true_b, epsilon, select_gather):
    """One batch tile: gather class means, hinge on L2 distance, partial sum."""
    feats = feat_ref[...]                       # [TILE_B, D] native dtype
    labels = labels_ref[...]                    # [TILE_B, 1] int32
    tile_b, d = feats.shape
    num_classes = means_ref.shape[0]

    if select_gather:
        # Small C: VPU select gather. Exact in the input dtype and avoids an
        # MXU matmul whose contraction dim would be padded to 128/256 lanes.
        means = means_ref[...].astype(jnp.float32)           # [C, D]
        gathered = jnp.zeros((tile_b, d), jnp.float32)
        for c in range(num_classes):
            row = means[c:c + 1, :]                           # [1, D]
            gathered = jnp.where(labels == c, row, gathered)  # [TILE_B, D]
    else:
        # Large C: one-hot gather on the MXU, fed in the native input dtype.
        # TODO(synk): for very large C, replace with a scalar-prefetch-driven
        # row gather (PrefetchScalarGridSpec) to avoid the [TILE_B, C] one-hot.
        class_ids = jax.lax.broadcasted_iota(jnp.int32, (tile_b, num_classes), 1)
        onehot = (labels == class_ids).astype(means_ref.dtype)
        gathered = jnp.dot(onehot, means_ref[...],
                           preferred_element_type=jnp.float32)

    # Distance / hinge math in f32 regardless of input dtype.
    diff = feats.astype(jnp.float32) - gathered
    sq_dist = jnp.sum(diff * diff, axis=-1, keepdims=True)    # [TILE_B, 1]
    dist = jnp.sqrt(sq_dist)
    hinge = jnp.maximum(epsilon - dist, 0.0)

    # Mask rows beyond the true batch size (ragged last tile was zero-padded).
    row_ids = (pl.program_id(0) * tile_b
               + jax.lax.broadcasted_iota(jnp.int32, (tile_b, 1), 0))
    hinge = jnp.where(row_ids < true_b, hinge, 0.0)

    # Lane-dense (8, 128) partial-sum tile; the wrapper reads element [i, 0, 0].
    out_ref[...] = jnp.broadcast_to(jnp.sum(hinge), (1, 8, 128))


def neural_collapse_loss(features, target_means, target_labels,
                         epsilon=EPSILON, tile_b=None):
    """features: [B, D]; target_means: [C, D]; target_labels: [B] int."""
    B, D = features.shape
    C, Dm = target_means.shape
    assert D == Dm, "feature dim mismatch"

    # Match jnp-style clamping for out-of-range labels.
    labels = jnp.clip(target_labels.astype(jnp.int32), 0, C - 1).reshape(B, 1)

    if tile_b is None:
        # Largest power-of-two batch tile whose double-buffered feature DMA
        # stays under ~8 MiB (comfortable on v5e/v6e/v7x scoped VMEM), capped
        # at the (8-aligned) batch size.
        tile_b = 512
        itemsize = jnp.dtype(features.dtype).itemsize
        while tile_b > 8 and 2 * tile_b * D * itemsize > (8 << 20):
            tile_b //= 2
        tile_b = min(tile_b, ((B + 7) // 8) * 8)
    assert tile_b % 8 == 0, "tile_b must be a multiple of 8 (sublane alignment)"

    num_tiles = pl.cdiv(B, tile_b)
    b_pad = num_tiles * tile_b
    if b_pad != B:
        features = jnp.pad(features, ((0, b_pad - B), (0, 0)))
        labels = jnp.pad(labels, ((0, b_pad - B), (0, 0)))

    kernel = functools.partial(
        _nc_loss_kernel,
        true_b=B,
        epsilon=float(epsilon),
        select_gather=(C < _SELECT_GATHER_MAX_C),
    )

    partial = pl.pallas_call(
        kernel,
        out_shape=jax.ShapeDtypeStruct((num_tiles, 8, 128), jnp.float32),
        grid_spec=pl.GridSpec(
            grid=(num_tiles,),
            in_specs=[
                pl.BlockSpec((tile_b, D), lambda i: (i, 0)),   # feature tile
                pl.BlockSpec((C, D), lambda i: (0, 0)),        # means (resident)
                pl.BlockSpec((tile_b, 1), lambda i: (i, 0)),   # label tile
            ],
            out_specs=pl.BlockSpec((1, 8, 128), lambda i: (i, 0, 0)),
        ),
        compiler_params=pltpu.CompilerParams(
            dimension_semantics=("parallel",),
            vmem_limit_bytes=32 * 1024 * 1024,
        ),
    )(features, target_means, labels)

    return jnp.sum(partial[:, 0, 0]) / jnp.float32(B)


def _reference_loss(features, target_means, target_labels, epsilon=EPSILON):
    gathered = target_means[target_labels]                     # [B, D]
    dist = jnp.sqrt(jnp.sum((features - gathered) ** 2, axis=-1))
    return jnp.mean(jnp.maximum(epsilon - dist, 0.0))


if __name__ == "__main__":
    # Case 1: small shapes implied by the module (B=8, D=32, C=4), select gather.
    k1, k2, k3 = jax.random.split(jax.random.PRNGKey(0), 3)
    B, D, C = 8, 32, 4
    means = jax.random.normal(k2, (C, D), dtype=jnp.float32)
    labels = jax.random.randint(k3, (B,), 0, C, dtype=jnp.int32)
    # Features near their class means so the hinge is non-trivially active.
    feats = means[labels] + 0.3 * jax.random.normal(k1, (B, D), dtype=jnp.float32)

    loss = neural_collapse_loss(feats, means, labels)
    jax.block_until_ready(loss)
    ref = _reference_loss(feats, means, labels)
    assert jnp.allclose(loss, ref, atol=1e-5, rtol=1e-5), (loss, ref)

    # Case 2: ragged, multi-tile batch (B=20, tile_b=8 -> 3 parallel tiles).
    k4, k5, k6 = jax.random.split(jax.random.PRNGKey(1), 3)
    B2, D2, C2 = 20, 128, 48
    means2 = jax.random.normal(k5, (C2, D2), dtype=jnp.float32)
    labels2 = jax.random.randint(k6, (B2,), 0, C2, dtype=jnp.int32)
    feats2 = means2[labels2] + 0.3 * jax.random.normal(k4, (B2, D2), dtype=jnp.float32)

    loss2 = neural_collapse_loss(feats2, means2, labels2, tile_b=8)
    jax.block_until_ready(loss2)
    ref2 = _reference_loss(feats2, means2, labels2)
    assert jnp.allclose(loss2, ref2, atol=1e-4, rtol=1e-4), (loss2, ref2)

    print("KERNEL_OK")
</pallas_src>

<mosaic_0001>
module attributes {stable_mosaic.version = 11 : i64} {
  func.func @_nc_loss_kernel(%arg0: i32, %arg1: memref<8x32xf32, #tpu.memory_space<vmem>>, %arg2: memref<4x32xf32, #tpu.memory_space<vmem>>, %arg3: memref<8x1xi32, #tpu.memory_space<vmem>>, %arg4: memref<1x8x128xf32, #tpu.memory_space<vmem>>) attributes {dimension_semantics = [#tpu.dimension_semantics<parallel>], iteration_bounds = array<i64: 1>, scalar_prefetch = 0 : i64, scratch_operands = 0 : i64, tpu.core_type = #tpu.core_type<tc>, window_params = [{transform_indices = @transform_0, window_bounds = array<i64: 8, 32>}, {pipeline_mode = #tpu.pipeline_mode<synchronous>, transform_indices = @transform_1, window_bounds = array<i64: 4, 32>}, {transform_indices = @transform_2, window_bounds = array<i64: 8, 1>}, {transform_indices = @transform_3, window_bounds = array<i64: 1, 8, 128>}]} {
    %c0 = arith.constant 0 : index
    %c0_0 = arith.constant 0 : index
    %0 = vector.load %arg1[%c0, %c0_0] : memref<8x32xf32, #tpu.memory_space<vmem>>, vector<8x32xf32>
    %c0_1 = arith.constant 0 : index
    %c0_2 = arith.constant 0 : index
    %1 = vector.load %arg3[%c0_1, %c0_2] : memref<8x1xi32, #tpu.memory_space<vmem>>, vector<8x1xi32>
    %c0_3 = arith.constant 0 : index
    %c0_4 = arith.constant 0 : index
    %2 = vector.load %arg2[%c0_3, %c0_4] : memref<4x32xf32, #tpu.memory_space<vmem>>, vector<4x32xf32>
    %cst = arith.constant 0.000000e+00 : f32
    %3 = vector.broadcast %cst : f32 to vector<8x32xf32>
    %4 = vector.extract_strided_slice %2 {offsets = [0, 0], sizes = [1, 32], strides = [1, 1]} : vector<4x32xf32> to vector<1x32xf32>
    %c0_i32 = arith.constant 0 : i32
    %5 = vector.broadcast %c0_i32 : i32 to vector<8x1xi32>
    %6 = arith.cmpi eq, %1, %5 : vector<8x1xi32>
    %7 = vector.shape_cast %6 : vector<8x1xi1> to vector<8x1xi1>
    %8 = vector.broadcast %7 : vector<8x1xi1> to vector<8x32xi1>
    %9 = vector.shape_cast %4 : vector<1x32xf32> to vector<1x32xf32>
    %10 = vector.broadcast %9 : vector<1x32xf32> to vector<8x32xf32>
    %11 = arith.select %8, %10, %3 : vector<8x32xi1>, vector<8x32xf32>
    %12 = vector.extract_strided_slice %2 {offsets = [1, 0], sizes = [1, 32], strides = [1, 1]} : vector<4x32xf32> to vector<1x32xf32>
    %c1_i32 = arith.constant 1 : i32
    %13 = vector.broadcast %c1_i32 : i32 to vector<8x1xi32>
    %14 = arith.cmpi eq, %1, %13 : vector<8x1xi32>
    %15 = vector.shape_cast %14 : vector<8x1xi1> to vector<8x1xi1>
    %16 = vector.broadcast %15 : vector<8x1xi1> to vector<8x32xi1>
    %17 = vector.shape_cast %12 : vector<1x32xf32> to vector<1x32xf32>
    %18 = vector.broadcast %17 : vector<1x32xf32> to vector<8x32xf32>
    %19 = arith.select %16, %18, %11 : vector<8x32xi1>, vector<8x32xf32>
    %20 = vector.extract_strided_slice %2 {offsets = [2, 0], sizes = [1, 32], strides = [1, 1]} : vector<4x32xf32> to vector<1x32xf32>
    %c2_i32 = arith.constant 2 : i32
    %21 = vector.broadcast %c2_i32 : i32 to vector<8x1xi32>
    %22 = arith.cmpi eq, %1, %21 : vector<8x1xi32>
    %23 = vector.shape_cast %22 : vector<8x1xi1> to vector<8x1xi1>
    %24 = vector.broadcast %23 : vector<8x1xi1> to vector<8x32xi1>
    %25 = vector.shape_cast %20 : vector<1x32xf32> to vector<1x32xf32>
    %26 = vector.broadcast %25 : vector<1x32xf32> to vector<8x32xf32>
    %27 = arith.select %24, %26, %19 : vector<8x32xi1>, vector<8x32xf32>
    %28 = vector.extract_strided_slice %2 {offsets = [3, 0], sizes = [1, 32], strides = [1, 1]} : vector<4x32xf32> to vector<1x32xf32>
    %c3_i32 = arith.constant 3 : i32
    %29 = vector.broadcast %c3_i32 : i32 to vector<8x1xi32>
    %30 = arith.cmpi eq, %1, %29 : vector<8x1xi32>
    %31 = vector.shape_cast %30 : vector<8x1xi1> to vector<8x1xi1>
    %32 = vector.broadcast %31 : vector<8x1xi1> to vector<8x32xi1>
    %33 = vector.shape_cast %28 : vector<1x32xf32> to vector<1x32xf32>
    %34 = vector.broadcast %33 : vector<1x32xf32> to vector<8x32xf32>
    %35 = arith.select %32, %34, %27 : vector<8x32xi1>, vector<8x32xf32>
    %36 = arith.subf %0, %35 : vector<8x32xf32>
    %37 = arith.mulf %36, %36 : vector<8x32xf32>
    %cst_5 = arith.constant dense<0.000000e+00> : vector<8xf32>
    %38 = vector.multi_reduction <add>, %37, %cst_5 [1] : vector<8x32xf32> to vector<8xf32>
    %39 = vector.shape_cast %38 : vector<8xf32> to vector<8x1xf32>
    %40 = math.sqrt %39 : vector<8x1xf32>
    %cst_6 = arith.constant 5.000000e+00 : f32
    %41 = vector.broadcast %cst_6 : f32 to vector<8x1xf32>
    %42 = arith.subf %41, %40 : vector<8x1xf32>
    %cst_7 = arith.constant 0.000000e+00 : f32
    %43 = vector.broadcast %cst_7 : f32 to vector<8x1xf32>
    %44 = arith.maximumf %42, %43 : vector<8x1xf32>
    %c8_i32 = arith.constant 8 : i32
    %45 = arith.muli %arg0, %c8_i32 : i32
    %46 = tpu.iota {dimensions = array<i32: 0>} : vector<8x1xi32>
    %47 = vector.broadcast %45 : i32 to vector<8x1xi32>
    %48 = arith.addi %47, %46 : vector<8x1xi32>
    %c8_i32_8 = arith.constant 8 : i32
    %49 = vector.broadcast %c8_i32_8 : i32 to vector<8x1xi32>
    %50 = arith.cmpi slt, %48, %49 : vector<8x1xi32>
    %cst_9 = arith.constant 0.000000e+00 : f32
    %51 = vector.broadcast %cst_9 : f32 to vector<8x1xf32>
    %52 = arith.select %50, %44, %51 : vector<8x1xi1>, vector<8x1xf32>
    %53 = vector.shape_cast %52 : vector<8x1xf32> to vector<1x8x1xf32>
    %cst_10 = arith.constant dense<0.000000e+00> : vector<1xf32>
    %54 = vector.multi_reduction <add>, %53, %cst_10 [1, 2] : vector<1x8x1xf32> to vector<1xf32>
    %55 = vector.shape_cast %54 : vector<1xf32> to vector<1x1x1xf32>
    %56 = vector.extract %55[0, 0, 0] : f32 from vector<1x1x1xf32>
    %57 = vector.broadcast %56 : f32 to vector<1x8x128xf32>
    %c0_11 = arith.constant 0 : index
    %c0_12 = arith.constant 0 : index
    %c0_13 = arith.constant 0 : index
    %58 = vector.load %arg4[%c0_11, %c0_12, %c0_13] : memref<1x8x128xf32, #tpu.memory_space<vmem>>, vector<1x8x128xf32>
    tpu.vector_store %arg4[%c0_11, %c0_12, %c0_13], %57 {strides = array<i32>} : memref<1x8x128xf32, #tpu.memory_space<vmem>>, vector<1x8x128xf32>,
    return
  }
  func.func @transform_0(%arg0: i32) -> (i32, i32) {
    %c0_i32 = arith.constant 0 : i32
    %c0_i32_0 = arith.constant 0 : i32
    return %arg0, %c0_i32 : i32, i32
  }
  func.func @transform_1(%arg0: i32) -> (i32, i32) {
    %c0_i32 = arith.constant 0 : i32
    %c0_i32_0 = arith.constant 0 : i32
    %c0_i32_1 = arith.constant 0 : i32
    return %c0_i32, %c0_i32_0 : i32, i32
  }
  func.func @transform_2(%arg0: i32) -> (i32, i32) {
    %c0_i32 = arith.constant 0 : i32
    %c0_i32_0 = arith.constant 0 : i32
    return %arg0, %c0_i32 : i32, i32
  }
  func.func @transform_3(%arg0: i32) -> (i32, i32, i32) {
    %c0_i32 = arith.constant 0 : i32
    %c0_i32_0 = arith.constant 0 : i32
    %c0_i32_1 = arith.constant 0 : i32
    return %arg0, %c0_i32, %c0_i32_0 : i32, i32, i32
  }
}

</mosaic_0001>

<bundles_post_ra>
// kernel: tpu_custom_call.1
= control target key start
LH: loop header
LB: loop body
LE: loop exit
PB: predicated region body
PF: predicated region fallthrough
CT: control target
= control target key end

     0   :  { %s186_s0 = inlined_call_operand.vmem [shape: f32[8,32], index: 0, kind: input, shape index: {}]   ;;  %s187_s1 = inlined_call_operand.vmem [shape: f32[4,32], index: 1, kind: input, shape index: {}]   ;;  %s188_s2 = inlined_call_operand.vmem [shape: s32[8,1], index: 2, kind: input, shape index: {}]   ;;  %s189_s3 = inlined_call_operand.hbm [shape: f32[1,8,128], index: 3, kind: output, shape index: {}]  }
   0x1   :  { %v16_v0 = vld [vmem:[%s188_s2] sm:$0xff] }
   0x2   :  { %8 = vsyncpa [#allocation3], 0  ;;  %v143_v1 = vmov 0   ;;  %vm40_vm0 = vcmp.eq.s32.totalorder %v16_v0, 2  ;;  %vm18_vm1 = vcmp.eq.s32.totalorder %v16_v0, 0  ;;  %vm51_vm2 = vcmp.eq.s32.totalorder %v16_v0, 3 }
   0x3   :  { %116 = vset.pattern.permute.xlu1 %v143_v1  ;;  %115 = vset.pattern.permute.xlu0 %v143_v1  ;;  %vm29_vm3 = vcmp.eq.s32.totalorder %v16_v0, 1  ;;  %v41_v2 = vsel %vm40_vm0, 1, %v143_v1  ;;  %v19_v3 = vsel %vm18_vm1, 1, %v143_v1  ;;  %v52_v4 = vsel %vm51_vm2, 1, %v143_v1  ;;  %v17_v9 = vld [vmem:[%s187_s1] sm:$0xf] }
   0x4   :  { %43 = vperm.xlu1 %116, %v41_v2   ;;  %21 = vperm.xlu0 %115, %v19_v3   ;;  %v30_v5 = vsel %vm29_vm3, 1, %v143_v1  ;;  %v24_v6 = vlaneseq  ;;  %v15_v23 = vld [vmem:[%s186_s0] sm:$0xff]  ;;  %vm64_vm8 = vcmask 261120   ;;  %vm84_vm11 = vcmask 7168   ;;  %s144_s0 = smov [#allocation2]  }
   0x5   :  { %s103_s1 = sshll.u32 %s144_s0, 4  ;;  %s104_s1 = int_to_ptr.vmem [resolvable:$true] %s103_s1 }
   0x6   :  { %v25_v7 = vshrl.u32 %v24_v6, 7  ;;  %s119_s18 = scalar_lea.vmem %s104_s1, 128  ;;  %p124_p1 = scmp.lt.s32.totalorder %s104_s1, %s104_s1 }
   0x7   :  { %p120_p0 = scmp.ne.s32.totalorder %s104_s1, %s119_s18  ;;  %p125_p2 = scmp.lt.s32.totalorder %s119_s18, %s119_s18 }
   0x8   :  { %54 = vperm.xlu1 %116, %v52_v4   ;;  %32 = vperm.xlu0 %115, %v30_v5   ;;  %v26_v8 = vsub.s32 0, %v25_v7  ;;  %v37_v10 = vsub.s32 1, %v25_v7  ;;  %v48_v11 = vsub.s32 2, %v25_v7  ;;  %v59_v14 = vsub.s32 3, %v25_v7 }
   0x9   :  { %p126_p3 = por %p125_p2, %p124_p1 }
   0xa   :  { %v27_v15 = vrot.slane %v17_v9, %v26_v8  ;;  %v38_v16 = vrot.slane %v17_v9, %v37_v10  ;;  %v49_v17 = vrot.slane %v17_v9, %v48_v11  ;;  %v60_v20 = vrot.slane %v17_v9, %v59_v14 }
   0xb   :  { %p127_p4 = pnand %p126_p3, %p120_p0 }
  0x83   :  { %v44_v12 = vpop.permute.xlu1 %43  ;;  %v22_v13 = vpop.permute.xlu0 %21 }
  0x84   :  { %vm23_vm4 = vcmp.eq.s32.totalorder %v22_v13, 1  ;;  %vm45_vm6 = vcmp.eq.s32.totalorder %v44_v12, 1 }
  0x85   :  { %v28_v21 = vsel %vm23_vm4, %v27_v15, 0.0 }
  0x87   :  { %v55_v18 = vpop.permute.xlu1 %54  ;;  %v33_v19 = vpop.permute.xlu0 %32 }
  0x88   :  { %vm34_vm5 = vcmp.eq.s32.totalorder %v33_v19, 1  ;;  %vm56_vm7 = vcmp.eq.s32.totalorder %v55_v18, 1 }
  0x89   :  { %v39_v22 = vsel %vm34_vm5, %v38_v16, %v28_v21 }
  0x8a   :  { %v50_v24 = vsel %vm45_vm6, %v49_v17, %v39_v22 }
  0x8b   :  { %v61_v25 = vsel %vm56_vm7, %v60_v20, %v50_v24 }
  0x8c   :  { %v62_v26 = vsub.f32 %v15_v23, %v61_v25 }
  0x8e   :  { %v63_v27 = vmul.f32 %v62_v26, %v62_v26 }
  0x90   :  { %v65_v28 = vsel %vm64_vm8, %v63_v27, 0.0 }
  0x91   :  { %66 = vadd.xlane.f32.xlu0 %v65_v28 }
 0x11e   :  { %v67_v29 = vpop.xlane.xlu0 %66 }
 0x11f   :  { %117 = vrsqrt.f32 %v67_v29  ;;  %vm70_vm9 = vcmp.eq.f32.partialorder %v67_v29, inf  ;;  %v73_v32 = vand.u32 2147483648, %v67_v29  ;;  %vm72_vm10 = vcmp.eq.f32.partialorder %v67_v29, 0.0 }
 0x129   :  { %v118_v30 = vpop.eup %117 }
 0x12a   :  { %v69_v31 = vmul.f32 %v118_v30, %v67_v29 }
 0x12c   :  { %v71_v33 = vsel %vm70_vm9, %v67_v29, %v69_v31 }
 0x12d   :  { %v74_v34 = vsel %vm72_vm10, %v73_v32, %v71_v33 }
 0x12e   :  { %v75_v35 = vsub.f32 5.0, %v74_v34 }
 0x130   :  { %v76_v36 = vmax.f32 %v75_v35, 0.0 }
 0x132   :  { %v85_v37 = vsel %vm84_vm11, %v76_v36, 0.0 }
 0x133   :  { %86 = vadd.xlane.f32.xlu1 %v85_v37 }
 0x1c0   :  { %v87_v38 = vpop.xlane.xlu1 %86 }
 0x1c1   :  { %v88_v39 = vrot.slane %v87_v38, 4 }
 0x1c3   :  { %v89_v40 = vadd.f32 %v88_v39, %v87_v38 }
 0x1c5   :  { %v90_v41 = vrot.slane %v89_v40, 2 }
 0x1c7   :  { %v91_v42 = vadd.f32 %v90_v41, %v89_v40 }
 0x1c9   :  { %v92_v43 = vrot.slane %v91_v42, 1 }
 0x1cb   :  { %v93_v44 = vadd.f32 %v92_v43, %v91_v42 }
 0x1cd   :  { %111 = vpush %v93_v44 }
 0x1fe   :  { %s112_s17 = spop %111 }
 0x1ff   :  { %v95_v45 = vstv %s112_s17 }
 0x200   :  { %96 = vst [vmem:[#allocation2] sm:$0xff] %v95_v45 }
 0x201   :  { %130 = shalt.err (!%p127_p4)
}
 0x202   :  { %s131_s21 = scalar_lea.hbm %s189_s3, 128 }
 0x203   :  { %p132_p5 = scmp.ne.s32.totalorder %s189_s3, %s131_s21  ;;  %p135_p6 = scmp.lt.u32.totalorder %s131_s21, %s189_s3 }
 0x205   :  { %p137_p7 = pnand %p135_p6, %p132_p5 }
 0x207   :  { %140 = shalt.err (!%p137_p7)
}
 0x208   :  { %106 = dma.vmem_to_hbm [thread:$0]  %s104_s1, 128, %s189_s3, [#allocation3]  }
 0x209   :  { %141 = dma.done.wait [#allocation3], 128  }
 0x20a   :  { %142 = vsyncadd [#allocation3], 4294967168 }
 0x20b   :  { %110 = vsyncpa [#allocation3], 1 }

</bundles_post_ra>
